<compile_context>
chip_gen: v7x
topology: tpu7x:2x2x1
jax: 0.10.0
libtpu: 0.0.40
codegen_flags: <defaults>
</compile_context>

<pallas_src>
import jax
import jax.numpy as jnp
from jax import lax
from jax.experimental import pallas as pl
from jax.experimental.pallas import tpu as pltpu


# ----------------------------------------------------------------------------
# Pallas kernel: whole (small) problem resident in VMEM; the fused bidirectional
# recurrence runs inside a single lax.fori_loop.
# ----------------------------------------------------------------------------
def bigru_kernel(x_ref, lens_ref, wih_ref, bi_ref, whh_ref, bhhn_ref,
                 out_ref, final_ref, gi_ref):
    TB, _ = x_ref.shape
    Bp = lens_ref.shape[0]
    T = TB // Bp
    H2 = whh_ref.shape[0]            # 2H
    H = H2 // 2
    H3 = 3 * H

    # (1) Input projection for all timesteps and both directions: one big MXU matmul.
    #     b_hh for the reset/update gates is already folded into bi (wrapper).
    gi_ref[...] = (jnp.dot(x_ref[...], wih_ref[...],
                           preferred_element_type=jnp.float32) + bi_ref[...])

    # Hoisted loop invariants (no per-iteration broadcast re-materialization).
    whh = whh_ref[...]                               # (2H, 6H) block-diagonal
    lens = lens_ref[...]                             # (Bp, 1) int32
    bhhn = bhhn_ref[...]                             # (1, 2H): [b_hn_fwd | b_hn_bwd]
    bhhn_f = jnp.broadcast_to(bhhn[:, :H], (Bp, H))
    bhhn_b = jnp.broadcast_to(bhhn[:, H:], (Bp, H))

    h0 = jnp.zeros((Bp, H2), jnp.float32)            # [:, :H]=fwd state, [:, H:]=bwd state

    def step(i, h_cat):
        tf = i                                       # forward time index
        tb = T - 1 - i                               # backward time index
        rf = pl.multiple_of(tf * Bp, Bp)
        rb = pl.multiple_of(tb * Bp, Bp)

        # (2) One block-diagonal matmul covers both directions' recurrent projections.
        gh = jnp.dot(h_cat, whh, preferred_element_type=jnp.float32)   # (Bp, 6H)

        gi_f = gi_ref[pl.ds(rf, Bp), :]              # (Bp, 6H) row-block at time tf
        gi_b = gi_ref[pl.ds(rb, Bp), :]

        h_f = h_cat[:, :H]
        h_b = h_cat[:, H:]

        # Forward cell (PyTorch gate order r|z|n; b_hr/b_hz already folded into gi).
        rz_f = jax.nn.sigmoid(gi_f[:, :2 * H] + gh[:, :2 * H])
        n_f = jnp.tanh(gi_f[:, 2 * H:H3] + rz_f[:, :H] * (gh[:, 2 * H:H3] + bhhn_f))
        z_f = rz_f[:, H:]
        hf_new = (1.0 - z_f) * n_f + z_f * h_f

        # Backward cell.
        rz_b = jax.nn.sigmoid(gi_b[:, H3:H3 + 2 * H] + gh[:, H3:H3 + 2 * H])
        n_b = jnp.tanh(gi_b[:, H3 + 2 * H:] + rz_b[:, :H] * (gh[:, H3 + 2 * H:] + bhhn_b))
        z_b = rz_b[:, H:]
        hb_new = (1.0 - z_b) * n_b + z_b * h_b

        # (3) Length-based validity (no float-mask tensor): select instead of mul-carry.
        valid_f = lens > tf                          # (Bp, 1) bool
        valid_b = lens > tb

        out_ref[pl.ds(rf, Bp), pl.ds(0, H)] = jnp.where(valid_f, hf_new, 0.0)
        out_ref[pl.ds(rb, Bp), pl.ds(H, H)] = jnp.where(valid_b, hb_new, 0.0)

        # Carry: freeze hidden over padding -> fwd final = hidden at length-1,
        # bwd recurrence effectively starts at the last valid token.
        return jnp.concatenate([jnp.where(valid_f, hf_new, h_f),
                                jnp.where(valid_b, hb_new, h_b)], axis=-1)

    final_ref[...] = lax.fori_loop(0, T, step, h0)


# ----------------------------------------------------------------------------
# Parameter packing: fold/concat per-direction weights into the kernel layout.
# ----------------------------------------------------------------------------
def _combine_params(p, H):
    H2, H3 = 2 * H, 3 * H

    wih_cat = jnp.concatenate([p["wih_f"], p["wih_b"]], axis=1)          # (D, 6H)

    def fold_bias(bih, bhh):
        # b_hh for r/z can be folded into the input-projection bias; b_hn cannot.
        return jnp.concatenate([bih[:, :H2] + bhh[:, :H2], bih[:, H2:]], axis=1)

    bi_cat = jnp.concatenate([fold_bias(p["bih_f"], p["bhh_f"]),
                              fold_bias(p["bih_b"], p["bhh_b"])], axis=1)  # (1, 6H)

    whh_bd = jnp.zeros((H2, 2 * H3), jnp.float32)
    whh_bd = whh_bd.at[:H, :H3].set(p["whh_f"]).at[H:, H3:].set(p["whh_b"])  # block-diag

    bhhn_cat = jnp.concatenate([p["bhh_f"][:, H2:], p["bhh_b"][:, H2:]], axis=1)  # (1, 2H)
    return wih_cat, bi_cat, whh_bd, bhhn_cat


# ----------------------------------------------------------------------------
# Wrapper (layout plumbing: transpose, sublane padding, slicing back).
# ----------------------------------------------------------------------------
def encoder_forward(x, mask, lengths, params, pad_pack=True):
    """x: [B, T, D] float32, mask: [B, T] bool, lengths: [B] int32 (sorted desc)."""
    B, T, D = x.shape
    H = params["whh_f"].shape[0]
    Bp = ((max(B, 8) + 7) // 8) * 8                  # pad batch to full sublanes

    xf = jnp.transpose(x.astype(jnp.float32), (1, 0, 2))             # (T, B, D)
    xf = jnp.pad(xf, ((0, 0), (0, Bp - B), (0, 0))).reshape(T * Bp, D)

    if pad_pack:
        lens = lengths.astype(jnp.int32)
    else:
        # nn.GRU without packing runs over the whole padded sequence; the mask is
        # only applied to the output afterwards.
        lens = jnp.full((B,), T, jnp.int32)
    lens_p = jnp.pad(lens, (0, Bp - B))[:, None]                      # (Bp, 1)

    wih_cat, bi_cat, whh_bd, bhhn_cat = _combine_params(params, H)

    vmem = lambda: pl.BlockSpec(memory_space=pltpu.MemorySpace.VMEM)

    out_flat, final_cat = pl.pallas_call(
        bigru_kernel,
        out_shape=(
            jax.ShapeDtypeStruct((T * Bp, 2 * H), jnp.float32),       # merged fwd|bwd output
            jax.ShapeDtypeStruct((Bp, 2 * H), jnp.float32),           # concatenated final
        ),
        in_specs=[vmem() for _ in range(6)],
        out_specs=(vmem(), vmem()),
        scratch_shapes=[pltpu.VMEM((T * Bp, 6 * H), jnp.float32)],    # precomputed gi
    )(xf, lens_p, wih_cat, bi_cat, whh_bd, bhhn_cat)

    output = out_flat.reshape(T, Bp, 2 * H)[:, :B, :]
    output = jnp.transpose(output, (1, 0, 2))                         # (B, T, 2H)
    if not pad_pack:
        output = output * mask.astype(output.dtype)[:, :, None]
    final = final_cat[:B][None]                                       # (1, B, 2H)
    return output, final


# ----------------------------------------------------------------------------
# Deterministic parameter init (matches nn.GRU shapes; weights pre-transposed
# to [in, 3H] so the kernel computes x @ W).
# ----------------------------------------------------------------------------
def init_params(key, input_size, hidden_size):
    bound = 1.0 / (hidden_size ** 0.5)
    keys = jax.random.split(key, 8)
    u = lambda k, shape: jax.random.uniform(k, shape, jnp.float32, -bound, bound)
    H3 = 3 * hidden_size
    return {
        "wih_f": u(keys[0], (input_size, H3)),
        "whh_f": u(keys[1], (hidden_size, H3)),
        "bih_f": u(keys[2], (1, H3)),
        "bhh_f": u(keys[3], (1, H3)),
        "wih_b": u(keys[4], (input_size, H3)),
        "whh_b": u(keys[5], (hidden_size, H3)),
        "bih_b": u(keys[6], (1, H3)),
        "bhh_b": u(keys[7], (1, H3)),
    }


# ----------------------------------------------------------------------------
# Pure-JAX reference (plain Python time loop) for verification.
# ----------------------------------------------------------------------------
def encoder_reference(x, lengths, p):
    B, T, D = x.shape
    H = p["whh_f"].shape[0]
    maskf = (jnp.arange(T)[None, :] < lengths[:, None]).astype(jnp.float32)

    def cell(x_t, h, wih, whh, bih, bhh):
        gi = x_t @ wih + bih
        gh = h @ whh + bhh
        r = jax.nn.sigmoid(gi[:, :H] + gh[:, :H])
        z = jax.nn.sigmoid(gi[:, H:2 * H] + gh[:, H:2 * H])
        n = jnp.tanh(gi[:, 2 * H:] + r * gh[:, 2 * H:])
        return (1.0 - z) * n + z * h

    h = jnp.zeros((B, H), jnp.float32)
    outs_f = []
    for t in range(T):
        m = maskf[:, t:t + 1]
        hn = cell(x[:, t], h, p["wih_f"], p["whh_f"], p["bih_f"], p["bhh_f"])
        outs_f.append(m * hn)
        h = m * hn + (1.0 - m) * h
    hf = h

    h = jnp.zeros((B, H), jnp.float32)
    outs_b = [None] * T
    for t in range(T - 1, -1, -1):
        m = maskf[:, t:t + 1]
        hn = cell(x[:, t], h, p["wih_b"], p["whh_b"], p["bih_b"], p["bhh_b"])
        outs_b[t] = m * hn
        h = m * hn + (1.0 - m) * h
    hb = h

    output = jnp.concatenate([jnp.stack(outs_f, 1), jnp.stack(outs_b, 1)], -1)
    final = jnp.concatenate([hf, hb], -1)[None]
    return output, final


if __name__ == "__main__":
    B, T, D, H = 2, 8, 16, 32          # batch, time, input_size, hidden_size

    key = jax.random.PRNGKey(0)
    kx, kp = jax.random.split(key)
    x = jax.random.normal(kx, (B, T, D), jnp.float32)
    lengths = jnp.array([8, 5], jnp.int32)                      # sorted descending
    mask = jnp.arange(T)[None, :] < lengths[:, None]            # [B, T] bool
    params = init_params(kp, D, H)

    # pad_pack=True path (pack_padded_sequence emulation)
    output, final = encoder_forward(x, mask, lengths, params, pad_pack=True)
    output, final = jax.block_until_ready((output, final))

    assert output.shape == (B, T, 2 * H), output.shape
    assert final.shape == (1, B, 2 * H), final.shape

    out_ref, fin_ref = encoder_reference(x, lengths, params)
    assert jnp.allclose(output, out_ref, atol=1e-4, rtol=1e-4), "output mismatch"
    assert jnp.allclose(final, fin_ref, atol=1e-4, rtol=1e-4), "final-state mismatch"

    # pad_pack=False path (full-sequence GRU, output masked afterwards)
    out2, fin2 = encoder_forward(x, mask, lengths, params, pad_pack=False)
    out2, fin2 = jax.block_until_ready((out2, fin2))
    out_ref2_full, fin_ref2 = encoder_reference(x, jnp.full((B,), T, jnp.int32), params)
    out_ref2 = out_ref2_full * mask.astype(jnp.float32)[:, :, None]
    assert jnp.allclose(out2, out_ref2, atol=1e-4, rtol=1e-4), "output mismatch (no pack)"
    assert jnp.allclose(fin2, fin_ref2, atol=1e-4, rtol=1e-4), "final mismatch (no pack)"

    print("KERNEL_OK")
</pallas_src>

<mosaic_0001>
module attributes {stable_mosaic.version = 11 : i64} {
  func.func @bigru_kernel(%arg0: memref<64x16xf32, #tpu.memory_space<vmem>>, %arg1: memref<8x1xi32, #tpu.memory_space<vmem>>, %arg2: memref<16x192xf32, #tpu.memory_space<vmem>>, %arg3: memref<1x192xf32, #tpu.memory_space<vmem>>, %arg4: memref<64x192xf32, #tpu.memory_space<vmem>>, %arg5: memref<1x64xf32, #tpu.memory_space<vmem>>, %arg6: memref<64x64xf32, #tpu.memory_space<vmem>>, %arg7: memref<8x64xf32, #tpu.memory_space<vmem>>, %arg8: memref<64x192xf32, #tpu.memory_space<vmem>>) attributes {dimension_semantics = [], scalar_prefetch = 0 : i64, scratch_operands = 1 : i64, tpu.core_type = #tpu.core_type<tc>} {
    %c0 = arith.constant 0 : index
    %c0_0 = arith.constant 0 : index
    %0 = vector.load %arg0[%c0, %c0_0] : memref<64x16xf32, #tpu.memory_space<vmem>>, vector<64x16xf32>
    %c0_1 = arith.constant 0 : index
    %c0_2 = arith.constant 0 : index
    %1 = vector.load %arg2[%c0_1, %c0_2] : memref<16x192xf32, #tpu.memory_space<vmem>>, vector<16x192xf32>
    %cst = arith.constant dense<0.000000e+00> : vector<64x192xf32>
    %2 = tpu.matmul %0, %1, %cst {dimension_numbers = #tpu.dot_dimension_numbers<[1], [0], [0], [1], [0, 0, 1, 1], [], []>} : vector<64x16xf32>, vector<16x192xf32>, vector<64x192xf32> -> vector<64x192xf32>
    %c0_3 = arith.constant 0 : index
    %c0_4 = arith.constant 0 : index
    %3 = vector.load %arg3[%c0_3, %c0_4] : memref<1x192xf32, #tpu.memory_space<vmem>>, vector<1x192xf32>
    %4 = vector.broadcast %3 : vector<1x192xf32> to vector<64x192xf32>
    %5 = arith.addf %2, %4 : vector<64x192xf32>
    %c0_5 = arith.constant 0 : index
    %c0_6 = arith.constant 0 : index
    %6 = vector.load %arg8[%c0_5, %c0_6] : memref<64x192xf32, #tpu.memory_space<vmem>>, vector<64x192xf32>
    tpu.vector_store %arg8[%c0_5, %c0_6], %5 {strides = array<i32>} : memref<64x192xf32, #tpu.memory_space<vmem>>, vector<64x192xf32>,
    %c0_7 = arith.constant 0 : index
    %c0_8 = arith.constant 0 : index
    %7 = vector.load %arg4[%c0_7, %c0_8] : memref<64x192xf32, #tpu.memory_space<vmem>>, vector<64x192xf32>
    %c0_9 = arith.constant 0 : index
    %c0_10 = arith.constant 0 : index
    %8 = vector.load %arg1[%c0_9, %c0_10] : memref<8x1xi32, #tpu.memory_space<vmem>>, vector<8x1xi32>
    %c0_11 = arith.constant 0 : index
    %c0_12 = arith.constant 0 : index
    %9 = vector.load %arg5[%c0_11, %c0_12] : memref<1x64xf32, #tpu.memory_space<vmem>>, vector<1x64xf32>
    %10 = vector.extract_strided_slice %9 {offsets = [0, 0], sizes = [1, 32], strides = [1, 1]} : vector<1x64xf32> to vector<1x32xf32>
    %11 = vector.shape_cast %10 : vector<1x32xf32> to vector<1x32xf32>
    %12 = vector.broadcast %11 : vector<1x32xf32> to vector<8x32xf32>
    %13 = vector.extract_strided_slice %9 {offsets = [0, 32], sizes = [1, 32], strides = [1, 1]} : vector<1x64xf32> to vector<1x32xf32>
    %14 = vector.shape_cast %13 : vector<1x32xf32> to vector<1x32xf32>
    %15 = vector.broadcast %14 : vector<1x32xf32> to vector<8x32xf32>
    %cst_13 = arith.constant 0.000000e+00 : f32
    %16 = vector.broadcast %cst_13 : f32 to vector<8x64xf32>
    %c0_i32 = arith.constant 0 : i32
    %c8_i32 = arith.constant 8 : i32
    %17 = arith.addi %c0_i32, %c8_i32 : i32
    %c1_i32 = arith.constant 1 : i32
    %18 = scf.for %arg9 = %c0_i32 to %17 step %c1_i32 iter_args(%arg10 = %16) -> (vector<8x64xf32>)  : i32 {
      %c7_i32 = arith.constant 7 : i32
      %20 = arith.subi %c7_i32, %arg9 : i32
      %c8_i32_17 = arith.constant 8 : i32
      %21 = arith.muli %arg9, %c8_i32_17 : i32
      %22 = tpu.assume_multiple %21, 8 : i32
      %c8_i32_18 = arith.constant 8 : i32
      %23 = arith.muli %20, %c8_i32_18 : i32
      %24 = tpu.assume_multiple %23, 8 : i32
      %cst_19 = arith.constant dense<0.000000e+00> : vector<8x192xf32>
      %25 = tpu.matmul %arg10, %7, %cst_19 {dimension_numbers = #tpu.dot_dimension_numbers<[1], [0], [0], [1], [0, 0, 1, 1], [], []>} : vector<8x64xf32>, vector<64x192xf32>, vector<8x192xf32> -> vector<8x192xf32>
      %26 = arith.index_cast %22 : i32 to index
      %c0_20 = arith.constant 0 : index
      %27 = vector.load %arg8[%26, %c0_20] : memref<64x192xf32, #tpu.memory_space<vmem>>, vector<8x192xf32>
      %28 = arith.index_cast %24 : i32 to index
      %c0_21 = arith.constant 0 : index
      %29 = vector.load %arg8[%28, %c0_21] : memref<64x192xf32, #tpu.memory_space<vmem>>, vector<8x192xf32>
      %30 = vector.extract_strided_slice %arg10 {offsets = [0, 0], sizes = [8, 32], strides = [1, 1]} : vector<8x64xf32> to vector<8x32xf32>
      %31 = vector.extract_strided_slice %arg10 {offsets = [0, 32], sizes = [8, 32], strides = [1, 1]} : vector<8x64xf32> to vector<8x32xf32>
      %32 = vector.extract_strided_slice %27 {offsets = [0, 0], sizes = [8, 64], strides = [1, 1]} : vector<8x192xf32> to vector<8x64xf32>
      %33 = vector.extract_strided_slice %25 {offsets = [0, 0], sizes = [8, 64], strides = [1, 1]} : vector<8x192xf32> to vector<8x64xf32>
      %34 = arith.addf %32, %33 : vector<8x64xf32>
      %35 = arith.negf %34 : vector<8x64xf32>
      %36 = math.exp %35 : vector<8x64xf32>
      %cst_22 = arith.constant 1.000000e+00 : f32
      %37 = vector.broadcast %cst_22 : f32 to vector<8x64xf32>
      %38 = arith.addf %37, %36 : vector<8x64xf32>
      %39 = arith.divf %37, %38 : vector<8x64xf32>
      %40 = vector.extract_strided_slice %27 {offsets = [0, 64], sizes = [8, 32], strides = [1, 1]} : vector<8x192xf32> to vector<8x32xf32>
      %41 = vector.extract_strided_slice %39 {offsets = [0, 0], sizes = [8, 32], strides = [1, 1]} : vector<8x64xf32> to vector<8x32xf32>
      %42 = vector.extract_strided_slice %25 {offsets = [0, 64], sizes = [8, 32], strides = [1, 1]} : vector<8x192xf32> to vector<8x32xf32>
      %43 = arith.addf %42, %12 : vector<8x32xf32>
      %44 = arith.mulf %41, %43 : vector<8x32xf32>
      %45 = arith.addf %40, %44 : vector<8x32xf32>
      %46 = math.tanh %45 : vector<8x32xf32>
      %47 = vector.extract_strided_slice %39 {offsets = [0, 32], sizes = [8, 32], strides = [1, 1]} : vector<8x64xf32> to vector<8x32xf32>
      %cst_23 = arith.constant 1.000000e+00 : f32
      %48 = vector.broadcast %cst_23 : f32 to vector<8x32xf32>
      %49 = arith.subf %48, %47 : vector<8x32xf32>
      %50 = arith.mulf %49, %46 : vector<8x32xf32>
      %51 = arith.mulf %47, %30 : vector<8x32xf32>
      %52 = arith.addf %50, %51 : vector<8x32xf32>
      %53 = vector.extract_strided_slice %29 {offsets = [0, 96], sizes = [8, 64], strides = [1, 1]} : vector<8x192xf32> to vector<8x64xf32>
      %54 = vector.extract_strided_slice %25 {offsets = [0, 96], sizes = [8, 64], strides = [1, 1]} : vector<8x192xf32> to vector<8x64xf32>
      %55 = arith.addf %53, %54 : vector<8x64xf32>
      %56 = arith.negf %55 : vector<8x64xf32>
      %57 = math.exp %56 : vector<8x64xf32>
      %cst_24 = arith.constant 1.000000e+00 : f32
      %58 = vector.broadcast %cst_24 : f32 to vector<8x64xf32>
      %59 = arith.addf %58, %57 : vector<8x64xf32>
      %60 = arith.divf %58, %59 : vector<8x64xf32>
      %61 = vector.extract_strided_slice %29 {offsets = [0, 160], sizes = [8, 32], strides = [1, 1]} : vector<8x192xf32> to vector<8x32xf32>
      %62 = vector.extract_strided_slice %60 {offsets = [0, 0], sizes = [8, 32], strides = [1, 1]} : vector<8x64xf32> to vector<8x32xf32>
      %63 = vector.extract_strided_slice %25 {offsets = [0, 160], sizes = [8, 32], strides = [1, 1]} : vector<8x192xf32> to vector<8x32xf32>
      %64 = arith.addf %63, %15 : vector<8x32xf32>
      %65 = arith.mulf %62, %64 : vector<8x32xf32>
      %66 = arith.addf %61, %65 : vector<8x32xf32>
      %67 = math.tanh %66 : vector<8x32xf32>
      %68 = vector.extract_strided_slice %60 {offsets = [0, 32], sizes = [8, 32], strides = [1, 1]} : vector<8x64xf32> to vector<8x32xf32>
      %cst_25 = arith.constant 1.000000e+00 : f32
      %69 = vector.broadcast %cst_25 : f32 to vector<8x32xf32>
      %70 = arith.subf %69, %68 : vector<8x32xf32>
      %71 = arith.mulf %70, %67 : vector<8x32xf32>
      %72 = arith.mulf %68, %31 : vector<8x32xf32>
      %73 = arith.addf %71, %72 : vector<8x32xf32>
      %74 = vector.broadcast %arg9 : i32 to vector<8x1xi32>
      %75 = arith.cmpi sgt, %8, %74 : vector<8x1xi32>
      %76 = vector.broadcast %20 : i32 to vector<8x1xi32>
      %77 = arith.cmpi sgt, %8, %76 : vector<8x1xi32>
      %cst_26 = arith.constant 0.000000e+00 : f32
      %78 = vector.shape_cast %75 : vector<8x1xi1> to vector<8x1xi1>
      %79 = vector.broadcast %78 : vector<8x1xi1> to vector<8x32xi1>
      %80 = vector.broadcast %cst_26 : f32 to vector<8x32xf32>
      %81 = arith.select %79, %52, %80 : vector<8x32xi1>, vector<8x32xf32>
      %82 = arith.index_cast %22 : i32 to index
      %c0_27 = arith.constant 0 : index
      %83 = vector.load %arg6[%82, %c0_27] : memref<64x64xf32, #tpu.memory_space<vmem>>, vector<8x32xf32>
      tpu.vector_store %arg6[%82, %c0_27], %81 {strides = array<i32>} : memref<64x64xf32, #tpu.memory_space<vmem>>, vector<8x32xf32>,
      %cst_28 = arith.constant 0.000000e+00 : f32
      %84 = vector.shape_cast %77 : vector<8x1xi1> to vector<8x1xi1>
      %85 = vector.broadcast %84 : vector<8x1xi1> to vector<8x32xi1>
      %86 = vector.broadcast %cst_28 : f32 to vector<8x32xf32>
      %87 = arith.select %85, %73, %86 : vector<8x32xi1>, vector<8x32xf32>
      %88 = arith.index_cast %24 : i32 to index
      %c32 = arith.constant 32 : index
      %89 = vector.load %arg6[%88, %c32] : memref<64x64xf32, #tpu.memory_space<vmem>>, vector<8x32xf32>
      tpu.vector_store %arg6[%88, %c32], %87 {strides = array<i32>} : memref<64x64xf32, #tpu.memory_space<vmem>>, vector<8x32xf32>,
      %90 = vector.shape_cast %75 : vector<8x1xi1> to vector<8x1xi1>
      %91 = vector.broadcast %90 : vector<8x1xi1> to vector<8x32xi1>
      %92 = arith.select %91, %52, %30 : vector<8x32xi1>, vector<8x32xf32>
      %93 = vector.shape_cast %77 : vector<8x1xi1> to vector<8x1xi1>
      %94 = vector.broadcast %93 : vector<8x1xi1> to vector<8x32xi1>
      %95 = arith.select %94, %73, %31 : vector<8x32xi1>, vector<8x32xf32>
      %96 = tpu.concatenate %92, %95 in 1 : vector<8x32xf32>, vector<8x32xf32> -> vector<8x64xf32>
      scf.yield %96 : vector<8x64xf32>
    }
    %c8_i32_14 = arith.constant 8 : i32
    %c0_15 = arith.constant 0 : index
    %c0_16 = arith.constant 0 : index
    %19 = vector.load %arg7[%c0_15, %c0_16] : memref<8x64xf32, #tpu.memory_space<vmem>>, vector<8x64xf32>
    tpu.vector_store %arg7[%c0_15, %c0_16], %18 {strides = array<i32>} : memref<8x64xf32, #tpu.memory_space<vmem>>, vector<8x64xf32>,
    return
  }
}

</mosaic_0001>

<bundles_post_ra>
// kernel: tpu_custom_call.1
= control target key start
LH: loop header
LB: loop body
LE: loop exit
PB: predicated region body
PF: predicated region fallthrough
CT: control target
= control target key end

     0   :  { %13 = vsyncpa [#allocation4], 0  ;;  %s935_s0 = inlined_call_operand.vmem [shape: f32[64,16], index: 0, kind: input, shape index: {}]   ;;  %s936_s1 = inlined_call_operand.vmem [shape: s32[8,1], index: 1, kind: input, shape index: {}]   ;;  %s937_s2 = inlined_call_operand.vmem [shape: f32[16,192], index: 2, kind: input, shape index: {}]   ;;  %s938_s3 = inlined_call_operand.vmem [shape: f32[1,192], index: 3, kind: input, shape index: {}]   ;;  %s939_s4 = inlined_call_operand.hbm [shape: f32[64,192], index: 4, kind: input, shape index: {}]   ;;  %s940_s5 = inlined_call_operand.vmem [shape: f32[1,64], index: 5, kind: input, shape index: {}]   ;;  %s941_s6 = inlined_call_operand.hbm [shape: f32[64,64], index: 6, kind: output, shape index: {0}]   ;;  %s942_s7 = inlined_call_operand.hbm [shape: f32[8,64], index: 7, kind: output, shape index: {1}]  }
   0x1   :  { %14 = vsyncpa [#allocation5], 0 }
   0x2   :  { %15 = vsyncpa [#allocation8], 0  ;;  %s678_s24 = smov [#allocation3]   ;;  %s590_s28 = scalar_lea.hbm %s939_s4, 2048 }
   0x3   :  { %s29_s25 = sshll.u32 %s678_s24, 4  ;;  %p591_p0 = scmp.ne.s32.totalorder %s939_s4, %s590_s28  ;;  %s30_s25 = int_to_ptr.vmem [resolvable:$true] %s29_s25 }
   0x4   :  { %p594_p1 = scmp.lt.u32.totalorder %s590_s28, %s939_s4 }
   0x6   :  { %p596_p2 = pnand %p594_p1, %p591_p0 }
   0x8   :  { %599 = shalt.err (!%p596_p2)
}
   0x9   :  { %s600_s10 = scalar_lea.vmem %s30_s25, 2048  ;;  %p605_p4 = scmp.lt.s32.totalorder %s30_s25, %s30_s25 }
   0xa   :  { %p601_p3 = scmp.ne.s32.totalorder %s30_s25, %s600_s10  ;;  %p606_p5 = scmp.lt.s32.totalorder %s600_s10, %s600_s10 }
   0xc   :  { %p607_p6 = por %p606_p5, %p605_p4 }
   0xe   :  { %p608_p7 = pnand %p607_p6, %p601_p3 }
  0x10   :  { %611 = shalt.err (!%p608_p7)
}
  0x11   :  { %s679_s11 = smov 256   ;;  %s680_s12 = smov 16  }
  0x12   :  { %35 = dma.hbm_to_vmem [thread:$0]  %s939_s4, 2048, %s30_s25, [#allocation4], %s679_s11, %s679_s11, %s680_s12  }
  0x13   :  { %664 = dma.done.wait [#allocation4], 2048  }
  0x14   :  { %665 = vsyncadd [#allocation4], 4294965248  ;;  %v681_v0 = vmov 0.0   ;;  %v743_v1 = vld [vmem:[#allocation3] sm:$0xff]  ;;  %v745_v2 = vld [vmem:[#allocation3 + $0x8] sm:$0xff]  ;;  %vm65_vm0 = vcmask 130048   ;;  %v55_v33 = vlaneseq }
  0x15   :  { %154 = vmatprep.mubr.f32.mxu0 %v681_v0  ;;  %178 = vmatprep.mubr.f32.mxu1 %v681_v0  ;;  %v747_v3 = vld [vmem:[#allocation3 + $0x10] sm:$0xff]  ;;  %v749_v4 = vld [vmem:[#allocation3 + $0x18] sm:$0xff]  ;;  %v751_v5 = vld [vmem:[#allocation3 + $0x20] sm:$0xff]  ;;  %vm204_vm1 = vcmask 523264  }
  0x16   :  { %v753_v6 = vld [vmem:[#allocation3 + $0x28] sm:$0xff]  ;;  %v755_v7 = vld [vmem:[#allocation3 + $0x30] sm:$0xff]  ;;  %v757_v8 = vld [vmem:[#allocation3 + $0x38] sm:$0xff]  ;;  %v56_v34 = vshrl.u32 %v55_v33, 7 }
  0x17   :  { %v759_v9 = vld [vmem:[#allocation3 + $0x40] sm:$0xff]  ;;  %v761_v10 = vld [vmem:[#allocation3 + $0x48] sm:$0xff]  ;;  %v763_v11 = vld [vmem:[#allocation3 + $0x50] sm:$0xff] }
  0x18   :  { %v765_v12 = vld [vmem:[#allocation3 + $0x58] sm:$0xff]  ;;  %v767_v13 = vld [vmem:[#allocation3 + $0x60] sm:$0xff]  ;;  %v769_v14 = vld [vmem:[#allocation3 + $0x68] sm:$0xff]  ;;  %v57_v35 = vsub.s32 0, %v56_v34  ;;  %v61_v37 = vsub.s32 1, %v56_v34 }
  0x19   :  { %v771_v15 = vld [vmem:[#allocation3 + $0x70] sm:$0xff]  ;;  %v773_v16 = vld [vmem:[#allocation3 + $0x78] sm:$0xff]  ;;  %v778_v17 = vld [vmem:[%s936_s1] sm:$0xff] }
  0x1a   :  { %v783_v18 = vld [vmem:[%s940_s5] ss:$0 sm:$0xff]  ;;  %v50_v19 = vld [vmem:[%s937_s2 + $0x8] sm:$0xff]  ;;  %v52_v20 = vld [vmem:[%s937_s2 + $0x18] sm:$0xff] }
  0x1b   :  { %v49_v21 = vld [vmem:[%s937_s2] sm:$0xff]  ;;  %v521_v22 = vpack.c.bf16 %v52_v20, %v50_v19  ;;  %v51_v23 = vld [vmem:[%s937_s2 + $0x10] sm:$0xff]  ;;  %v42_v27 = vld [vmem:[%s935_s0 + $0x8] sm:$0xff] }
  0x1c   :  { %v523_v24 = vpack.c.bf16 %v51_v23, %v49_v21  ;;  %v41_v25 = vld [vmem:[%s935_s0] sm:$0xff]  ;;  %v46_v28 = vld [vmem:[%s935_s0 + $0x28] sm:$0xff]  ;;  %v43_v29 = vld [vmem:[%s935_s0 + $0x10] sm:$0xff] }
  0x1d   :  { %522 = vmatprep.subr.bf16.mxu0 %v521_v22  ;;  %541 = vmatprep.subr.bf16.mxu1 %v521_v22  ;;  %v45_v26 = vld [vmem:[%s935_s0 + $0x20] sm:$0xff]  ;;  %v47_v30 = vld [vmem:[%s935_s0 + $0x30] sm:$0xff]  ;;  %v44_v31 = vld [vmem:[%s935_s0 + $0x18] sm:$0xff] }
  0x1e   :  { %524 = vmatpush1.bf16.msra.mxu0 %v523_v24  ;;  %542 = vmatpush1.bf16.msra.mxu1 %v523_v24  ;;  %v48_v32 = vld [vmem:[%s935_s0 + $0x38] sm:$0xff]  ;;  %v53_v36 = vld [vmem:[%s938_s3] sm:$0x3]  ;;  %s842_s0 = smov 0  }
  0x1f   :  { %v58_v38 = vrot.slane %v53_v36, %v57_v35  ;;  %v62_v39 = vrot.slane %v53_v36, %v61_v37 }
  0x21   :  { %500 = vmatmul.mubr.msk.f32.vlgmr.msra.gmra.mrb[0].mxu0 %vm65_vm0, %v41_v25  ;;  %504 = vmatmul.mubr.msk.f32.vlgmr.msra.gmra.mrb[0].mxu1 %vm65_vm0, %v45_v26  ;;  %v840_v26 = vmov 0.0  }
  0x22   :  { %160 = vmatprep.mubr.f32.mxu0 %v681_v0  ;;  %184 = vmatprep.mubr.f32.mxu1 %v681_v0 }
  0x25   :  { %501 = vmatmul.mubr.msk.f32.gmra.mrb[2].mxu0 %vm65_vm0, %v42_v27  ;;  %505 = vmatmul.mubr.msk.f32.gmra.mrb[2].mxu1 %vm65_vm0, %v46_v28 }
  0x26   :  { %166 = vmatprep.mubr.f32.mxu0 %v681_v0  ;;  %190 = vmatprep.mubr.f32.mxu1 %v681_v0 }
  0x29   :  { %502 = vmatmul.mubr.msk.f32.gmra.mrb[4].mxu0 %vm65_vm0, %v43_v29  ;;  %506 = vmatmul.mubr.msk.f32.gmra.mrb[4].mxu1 %vm65_vm0, %v47_v30 }
  0x2a   :  { %172 = vmatprep.mubr.f32.mxu0 %v681_v0  ;;  %196 = vmatprep.mubr.f32.mxu1 %v681_v0 }
  0x2d   :  { %503 = vmatmul.mubr.msk.f32.gmra.mrb[6].mxu0 %vm65_vm0, %v44_v31  ;;  %507 = vmatmul.mubr.msk.f32.gmra.mrb[6].mxu1 %vm65_vm0, %v48_v32 }
  0xf4   :  { %v156_v40 = vpop.f32.mrb[0].mxu0  ;;  %v180_v41 = vpop.f32.mrb[0].mxu1 }
  0xf5   :  { %v157_v42 = vadd.f32 %v156_v40, %v58_v38  ;;  %v181_v43 = vadd.f32 %v180_v41, %v58_v38  ;;  %v158_v44 = vpop.f32.mrb[1].mxu0  ;;  %v182_v45 = vpop.f32.mrb[1].mxu1 }
  0xf6   :  { %v159_v46 = vadd.f32 %v158_v44, %v62_v39  ;;  %v183_v47 = vadd.f32 %v182_v45, %v62_v39 }
  0xf7   :  { %203 = vst [vmem:[#allocation2] sm:$0xff] %v157_v42  ;;  %212 = vst [vmem:[#allocation2 + $0x40] sm:$0xff] %v181_v43 }
  0xf8   :  { %205 = vst.msk [vmem:[#allocation2 + $0x8] sm:$0xff] %vm204_vm1, %v159_v46  ;;  %213 = vst.msk [vmem:[#allocation2 + $0x48] sm:$0xff] %vm204_vm1, %v183_v47  ;;  %v162_v48 = vpop.f32.mrb[2].mxu0  ;;  %v186_v49 = vpop.f32.mrb[2].mxu1 }
  0xf9   :  { %v163_v50 = vadd.f32 %v162_v48, %v58_v38  ;;  %v187_v51 = vadd.f32 %v186_v49, %v58_v38  ;;  %v164_v52 = vpop.f32.mrb[3].mxu0  ;;  %v188_v53 = vpop.f32.mrb[3].mxu1 }
  0xfa   :  { %v165_v54 = vadd.f32 %v164_v52, %v62_v39  ;;  %v189_v55 = vadd.f32 %v188_v53, %v62_v39 }
  0xfb   :  { %206 = vst [vmem:[#allocation2 + $0x10] sm:$0xff] %v163_v50  ;;  %214 = vst [vmem:[#allocation2 + $0x50] sm:$0xff] %v187_v51 }
  0xfc   :  { %207 = vst.msk [vmem:[#allocation2 + $0x18] sm:$0xff] %vm204_vm1, %v165_v54  ;;  %215 = vst.msk [vmem:[#allocation2 + $0x58] sm:$0xff] %vm204_vm1, %v189_v55  ;;  %v168_v56 = vpop.f32.mrb[4].mxu0  ;;  %v192_v57 = vpop.f32.mrb[4].mxu1 }
  0xfd   :  { %v169_v58 = vadd.f32 %v168_v56, %v58_v38  ;;  %v193_v59 = vadd.f32 %v192_v57, %v58_v38  ;;  %v170_v60 = vpop.f32.mrb[5].mxu0  ;;  %v194_v61 = vpop.f32.mrb[5].mxu1 }
  0xfe   :  { %v171_v62 = vadd.f32 %v170_v60, %v62_v39  ;;  %v195_v63 = vadd.f32 %v194_v61, %v62_v39 }
  0xff   :  { %208 = vst [vmem:[#allocation2 + $0x20] sm:$0xff] %v169_v58  ;;  %216 = vst [vmem:[#allocation2 + $0x60] sm:$0xff] %v193_v59 }
 0x100   :  { %209 = vst.msk [vmem:[#allocation2 + $0x28] sm:$0xff] %vm204_vm1, %v171_v62  ;;  %217 = vst.msk [vmem:[#allocation2 + $0x68] sm:$0xff] %vm204_vm1, %v195_v63  ;;  %v174_v0 = vpop.f32.mrb[6].mxu0  ;;  %v198_v19 = vpop.f32.mrb[6].mxu1 }
 0x101   :  { %v175_v20 = vadd.f32 %v174_v0, %v58_v38  ;;  %v199_v21 = vadd.f32 %v198_v19, %v58_v38  ;;  %v176_v22 = vpop.f32.mrb[7].mxu0  ;;  %v200_v23 = vpop.f32.mrb[7].mxu1 }
 0x102   :  { %v177_v24 = vadd.f32 %v176_v22, %v62_v39  ;;  %v201_v25 = vadd.f32 %v200_v23, %v62_v39 }
 0x103   :  { %210 = vst [vmem:[#allocation2 + $0x30] sm:$0xff] %v175_v20  ;;  %218 = vst [vmem:[#allocation2 + $0x70] sm:$0xff] %v199_v21 }
 0x104   :  { %211 = vst.msk [vmem:[#allocation2 + $0x38] sm:$0xff] %vm204_vm1, %v177_v24  ;;  %219 = vst.msk [vmem:[#allocation2 + $0x78] sm:$0xff] %vm204_vm1, %v201_v25 }
 0x105 LB: > { %v525_v27 = vpack.c.bf16 %v749_v4, %v745_v2  ;;  %v527_v28 = vpack.c.bf16 %v747_v3, %v743_v1  ;;  %v529_v29 = vpack.c.bf16 %v757_v8, %v753_v6  ;;  %s682_s3 = smov 64   ;;  %v531_v30 = vpack.c.bf16 %v755_v7, %v751_v5  ;;  %s251_s17 = ssub.s32 7, %s676_s0  ;;  %s676_s0 = sphi %s842_s0, %s249_s0   ;;  %v672_v26 = vphi %v840_v26, %v943_v26  }
 0x106   : > { %348 = vrot.lane.b32.xlu0 %v783_v18, %s682_s3  ;;  %v683_v31 = vmov 0.0   ;;  %v533_v32 = vpack.c.bf16 %v765_v12, %v761_v10  ;;  %v535_v33 = vpack.c.bf16 %v763_v11, %v759_v9  ;;  %v537_v34 = vpack.c.bf16 %v773_v16, %v769_v14  ;;  %s509_s18 = sshll.u32 %s676_s0, 3  ;;  %s875_s19 = sshll.u32 %s251_s17, 3 }
 0x107   : > { %526 = vmatprep.subr.bf16.mxu0 %v525_v27  ;;  %321 = vmatprep.mubr.f32.mxu0 %v683_v31  ;;  %v539_v35 = vpack.c.bf16 %v771_v15, %v767_v13  ;;  %v684_v36 = vmov 0   ;;  %s328_s20 = sshra.s32 %s509_s18, 3  ;;  %s334_s21 = sshra.s32 %s875_s19, 3  ;;  %v411_v52 = vstv %s676_s0  ;;  %v413_v53 = vstv %s251_s17 }
 0x108   : > { %528 = vmatpush1.bf16.msra.mxu0 %v527_v28  ;;  %572 = vset.pattern.permute.xlu1 %v684_v36  ;;  %s519_s22 = sshll.u32 %s328_s20, 4  ;;  %s880_s23 = sshll.u32 %s334_s21, 4  ;;  %vm412_vm2 = vcmp.gt.s32.totalorder %v778_v17, %v411_v52  ;;  %vm414_vm3 = vcmp.gt.s32.totalorder %v778_v17, %v413_v53  ;;  %vm426_vm6 = vcmask 261120   ;;  %vm439_vm7 = vcmask 523520  }
 0x109   : > { %530 = vmatprep.subr.bf16.mxu0 %v529_v29  ;;  %573 = vset.pattern.permute.xlu0 %v684_v36  ;;  %s332_s1 = scalar_lea.vmem [#allocation2], %s519_s22  ;;  %s338_s24 = scalar_lea.vmem [#allocation2], %s880_s23  ;;  %v415_v60 = vsel %vm412_vm2, 1, %v684_v36  ;;  %v428_v61 = vsel %vm414_vm3, 1, %v684_v36 }
 0x10a   : > { %s685_s5 = smov 32   ;;  %s686_s25 = smov 96  }
 0x10b   : > { %v333_v42 = vld [vmem:[%s332_s1] sm:$0xff]  ;;  %v340_v63 = vld [vmem:[%s338_s24 + $0x8] sm:$0xff]  ;;  %s425_s26 = scalar_lea.vmem [#allocation6], %s509_s18  ;;  %s438_s27 = scalar_lea.vmem [#allocation6], %s875_s19 }
 0x10c   : > { %532 = vmatpush1.bf16.msra.mxu0 %v531_v30  ;;  %v339_v43 = vld [vmem:[%s338_s24] sm:$0xff]  ;;  %s249_s0 = sadd.s32 1, %s676_s0  }
 0x10d   : > { %534 = vmatprep.subr.bf16.mxu0 %v533_v32  ;;  %p246_p8 = scmp.ge.s32.totalorder %s249_s0, 8  }
 0x10e   :  { %s687_s2 = smov (%p246_p8), [#allocation6]  }
 0x10f   :  { %s458_s28 = sshll.u32 (%p246_p8), %s687_s2, 4  ;;  %s459_s28 = int_to_ptr.vmem [resolvable:$true] %s458_s28 }
 0x110   : > { %536 = vmatpush1.bf16.msra.mxu0 %v535_v33  ;;  %s612_s29 = scalar_lea.vmem (%p246_p8), %s459_s28, 1024  ;;  %p617_p10 = scmp.lt.s32.totalorder (%p246_p8), %s459_s28, %s459_s28 }
 0x111   : > { %538 = vmatprep.subr.bf16.mxu0 %v537_v34  ;;  %p613_p9 = scmp.ne.s32.totalorder (%p246_p8), %s459_s28, %s612_s29  ;;  %p618_p11 = scmp.lt.s32.totalorder (%p246_p8), %s612_s29, %s612_s29 }
 0x113   :  { %p619_p12 = por (%p246_p8), %p618_p11, %p617_p10 }
 0x114   : > { %540 = vmatpush1.bf16.msra.mxu0 %v539_v35 }
 0x115   :  { %p620_p13 = pnand (%p246_p8), %p619_p12, %p613_p9 }
 0x117   : > { %511 = vmatmul.mubr.msk.f32.vlgmr.msra.gmra.mrb[0].mxu0 %vm204_vm1, %v672_v26 }
 0x178   : > { %v349_v37 = vpop.permute.xlu0 %348 }
 0x1ea   : > { %v323_v38 = vpop.f32.mrb[0].mxu0 }
 0x1eb   : > { %v351_v39 = vadd.f32 %v349_v37, %v323_v38  ;;  %v325_v40 = vpop.f32.mrb[1].mxu0  ;;  %v341_v44 = vadd.f32 %v333_v42, %v323_v38  ;;  %v374_v45 = vadd.f32 %v339_v43, %v323_v38 }
 0x1ec   : > { %v388_v41 = vadd.f32 %v783_v18, %v325_v40  ;;  %v375_v23 = vadd.f32 %v340_v63, %v325_v40 }
 0x1ed   : > { %353 = vrot.lane.b32.xlu0 %v351_v39, %s682_s3  ;;  %v516_v46 = vmul.f32 -1.442695, %v341_v44  ;;  %v517_v47 = vmul.f32 -1.442695, %v374_v45 }
 0x1ee   : > { %390 = vrot.lane.b32.xlu1 %v388_v41, %s682_s3  ;;  %v518_v24 = vmul.f32 -1.442695, %v375_v23 }
 0x1ef   : > { %574 = vpow2.f32 %v516_v46 }
 0x1f0   : > { %576 = vpow2.f32 %v517_v47 }
 0x1f9   : > { %v575_v48 = vpop.eup %574 }
 0x1fa   : > { %v577_v49 = vpop.eup %576  ;;  %v345_v50 = vadd.f32 1.0, %v575_v48 }
 0x1fb   : > { %v382_v51 = vadd.f32 1.0, %v577_v49 }
 0x1fc   : > { %578 = vrcp.f32 %v345_v50 }
 0x1fd   : > { %580 = vrcp.f32 %v382_v51 }
 0x206   : > { %v579_v54 = vpop.eup %578 }
 0x207   : > { %v581_v56 = vpop.eup %580  ;;  %v363_v31 = vsub.f32 1.0, %v579_v54 }
 0x25f   : > { %v354_v55 = vpop.permute.xlu0 %353 }
 0x260   : > { %v356_v57 = vmul.f32 %v579_v54, %v354_v55  ;;  %v391_v58 = vpop.permute.xlu1 %390 }
 0x261   : > { %v393_v59 = vmul.f32 %v581_v56, %v391_v58 }
 0x262   : > { %358 = vrot.lane.b32.xlu1 %v356_v57, %s682_s3 }
 0x263   : > { %395 = vrot.lane.b32.xlu0 %v393_v59, %s682_s3 }
 0x266   : > { %417 = vperm.xlu1 %572, %v415_v60  }
 0x267   : > { %430 = vperm.xlu0 %573, %v428_v61  }
 0x26a   : > { %369 = vrot.lane.b32.xlu1 %v672_v26, %s685_s5 }
 0x2d4   : > { %v359_v62 = vpop.permute.xlu1 %358 }
 0x2d5   : > { %v361_v0 = vadd.f32 %v359_v62, %v333_v42  ;;  %v396_v19 = vpop.permute.xlu0 %395 }
 0x2d6   : > { %v398_v20 = vadd.f32 %v396_v19, %v340_v63 }
 0x2d7   : > { %582 = vtanh.f32 %v361_v0 }
 0x2d8   : > { %584 = vtanh.f32 %v398_v20 }
 0x2d9   : > { %586 = vpow2.f32 %v518_v24 }
 0x2e1   : > { %v583_v21 = vpop.eup %582 }
 0x2e2   : > { %v585_v22 = vpop.eup %584  ;;  %365 = vrot.lane.b32.xlu1 %v583_v21, %s686_s25 }
 0x2e3   : > { %402 = vrot.lane.b32.xlu0 %v585_v22, %s686_s25  ;;  %v587_v25 = vpop.eup %586 }
 0x2e4   : > { %v383_v27 = vadd.f32 1.0, %v587_v25 }
 0x2e5   : > { %v418_v28 = vpop.permute.xlu1 %417 }
 0x2e6   : > { %406 = vrot.lane.b32.xlu1 %v672_v26, %s686_s25  ;;  %588 = vrcp.f32 %v383_v27  ;;  %v431_v30 = vpop.permute.xlu0 %430  ;;  %vm419_vm4 = vcmp.eq.s32.totalorder %v418_v28, 1 }
 0x2e7   : > { %vm432_vm5 = vcmp.eq.s32.totalorder %v431_v30, 1 }
 0x2e9   : > { %v370_v29 = vpop.permute.xlu1 %369 }
 0x2ea   : > { %v372_v34 = vmul.f32 %v579_v54, %v370_v29 }
 0x2f0   : > { %v589_v32 = vpop.eup %588 }
 0x2f1   : > { %v400_v38 = vsub.f32 1.0, %v589_v32 }
 0x354   : > { %v366_v33 = vpop.permute.xlu1 %365 }
 0x355   : > { %v368_v35 = vmul.f32 %v366_v33, %v363_v31  ;;  %v403_v36 = vpop.permute.xlu0 %402 }
 0x356   : > { %v405_v39 = vmul.f32 %v403_v36, %v400_v38 }
 0x357   : > { %v373_v37 = vadd.f32 %v372_v34, %v368_v35 }
 0x358   : > { %v407_v26 = vpop.permute.xlu1 %406 }
 0x359   : > { %v409_v40 = vmul.f32 %v589_v32, %v407_v26  ;;  %v420_v41 = vsel %vm419_vm4, %v373_v37, 0.0  ;;  %v441_v43 = vsel %vm419_vm4, %v373_v37, %v370_v29 }
 0x35a   : > { %422 = vrot.lane.b32.xlu0 %v420_v41, %s686_s25 }
 0x35b   : > { %v410_v42 = vadd.f32 %v409_v40, %v405_v39 }
 0x35d   : > { %v433_v44 = vsel %vm432_vm5, %v410_v42, 0.0  ;;  %v442_v45 = vsel %vm432_vm5, %v410_v42, %v407_v26 }
 0x35e   : > { %444 = vrot.lane.b32.xlu0 %v441_v43, %s686_s25  ;;  %435 = vrot.lane.b32.xlu1 %v433_v44, %s685_s5 }
 0x362   : > { %448 = vrot.lane.b32.xlu1 %v442_v45, %s685_s5 }
 0x3cc   : > { %v423_v46 = vpop.permute.xlu0 %422 }
 0x3cd   : > { %427 = vst.msk [vmem:[%s425_s26] sm:$0xff] %vm426_vm6, %v423_v46 }
 0x3d0   : > { %v436_v47 = vpop.permute.xlu1 %435  ;;  %v445_v48 = vpop.permute.xlu0 %444  ;;  %248 = sbr.rel (!%p246_p8) target bundleno = 261 (0x105), region = 67 }
 0x3d1   : > { %440 = vst.msk [vmem:[%s438_s27] sm:$0xff] %vm439_vm7, %v436_v47 }
 0x3d4   : > { %v449_v49 = vpop.permute.xlu1 %448 }
 0x3d5   : > { %v451_v50 = vsel %vm426_vm6, %v445_v48, %v449_v49  }
 0x3d6   : > { %v943_v26 = vmov %v451_v50  ;;  %452 = vst.msk [vmem:[#allocation7] sm:$0xff] (%p246_p8), %vm204_vm1, %v451_v50 }
 0x3d7   :  { %623 = shalt.err (!%p620_p13)
}
 0x3d8   :  { %s624_s9 = scalar_lea.hbm %s941_s6, 1024 }
 0x3d9   :  { %p625_p0 = scmp.ne.s32.totalorder %s941_s6, %s624_s9  ;;  %p628_p1 = scmp.lt.u32.totalorder %s624_s9, %s941_s6 }
 0x3db   :  { %p630_p2 = pnand %p628_p1, %p625_p0 }
 0x3dd   :  { %633 = shalt.err (!%p630_p2)
}
 0x3de   :  { %s688_s14 = smov 128   ;;  %s689_s4 = smov 8  }
 0x3df   :  { %464 = dma.vmem_to_hbm [thread:$0]  %s459_s28, 1024, %s941_s6, [#allocation5], %s688_s14, %s688_s14, %s689_s4  }
 0x3e0   :  { %s690_s0 = smov [#allocation7]  }
 0x3e1   :  { %s471_s3 = sshll.u32 %s690_s0, 4  ;;  %s472_s3 = int_to_ptr.vmem [resolvable:$true] %s471_s3 }
 0x3e2   :  { %s634_s17 = scalar_lea.vmem %s472_s3, 128  ;;  %p639_p4 = scmp.lt.s32.totalorder %s472_s3, %s472_s3 }
 0x3e3   :  { %p635_p3 = scmp.ne.s32.totalorder %s472_s3, %s634_s17  ;;  %p640_p5 = scmp.lt.s32.totalorder %s634_s17, %s634_s17 }
 0x3e5   :  { %p641_p6 = por %p640_p5, %p639_p4 }
 0x3e7   :  { %p642_p7 = pnand %p641_p6, %p635_p3 }
 0x3e9   :  { %645 = shalt.err (!%p642_p7)
}
 0x3ea   :  { %s646_s20 = scalar_lea.hbm %s942_s7, 128 }
 0x3eb   :  { %p647_p8 = scmp.ne.s32.totalorder %s942_s7, %s646_s20  ;;  %p650_p9 = scmp.lt.u32.totalorder %s646_s20, %s942_s7 }
 0x3ed   :  { %p652_p10 = pnand %p650_p9, %p647_p8 }
 0x3ef   :  { %655 = shalt.err (!%p652_p10)
}
 0x3f0   :  { %474 = dma.vmem_to_hbm [thread:$0]  %s472_s3, 128, %s942_s7, [#allocation8]  }
 0x3f1   :  { %666 = dma.done.wait [#allocation5], 1024  }
 0x3f2   :  { %667 = vsyncadd [#allocation5], 4294966272 }
 0x3f3   :  { %668 = dma.done.wait [#allocation8], 128  }
 0x3f4   :  { %669 = vsyncadd [#allocation8], 4294967168 }
 0x3f5   :  { %481 = vsyncpa [#allocation4], 1 }
 0x3f6   :  { %482 = vsyncpa [#allocation5], 1 }
 0x3f7   :  { %483 = vsyncpa [#allocation8], 1 }

</bundles_post_ra>
